<compile_context>
chip_gen: v5e
topology: v5e:2x2
jax: 0.10.0
libtpu: 0.0.40
codegen_flags: <defaults>
</compile_context>

<pallas_src>
import functools

import jax
import jax.numpy as jnp
from jax.experimental import pallas as pl
from jax.experimental.pallas import tpu as pltpu


def _round_up(x, m):
    return ((x + m - 1) // m) * m


def _pick_tile(dim, candidates=(512, 256, 128)):
    for c in candidates:
        if dim % c == 0:
            return c
    return candidates[-1]


def _conv_bn_relu_mm_kernel(p_ref, w_ref, shift_ref, o_ref, acc_ref, *, apply_relu):
    """Tiled (M, K) x (K, Cout) matmul with folded-BN shift + ReLU epilogue.

    p_ref:     (tm, tk)  im2col patch tile (compute dtype)
    w_ref:     (tk, tn)  BN-scale-folded weight tile (compute dtype)
    shift_ref: (1, tn)   folded BN shift (f32)
    o_ref:     (tm, tn)  output tile (lane-dense, tn is a multiple of 128)
    acc_ref:   (tm, tn)  f32 VMEM accumulator, resident across the K grid axis
    """
    k = pl.program_id(2)

    @pl.when(k == 0)
    def _():
        acc_ref[...] = jnp.zeros_like(acc_ref)

    acc_ref[...] += jnp.dot(p_ref[...], w_ref[...],
                            preferred_element_type=jnp.float32)

    @pl.when(k == pl.num_programs(2) - 1)
    def _():
        y = acc_ref[...] + shift_ref[...]          # BN shift (scale is in W)
        if apply_relu:
            y = jnp.maximum(y, 0.0)
        o_ref[...] = y.astype(o_ref.dtype)


def basic_conv(x_nchw, weight, gamma, beta, running_mean, running_var,
               *, stride=1, padding=0, eps=1e-5, relu=True, compute_dtype=None):
    """BasicConv forward: Conv2d(bias=False) + BatchNorm2d(eval) + optional ReLU.

    x_nchw: (N, Cin, H, W). weight: (KH, KW, Cin, Cout) [HWIO].
    compute_dtype: dtype of the matmul operands (use jnp.bfloat16 on v6e/v7x);
    accumulation stays f32. None -> x dtype.
    """
    # TODO(synk): groups != 1 and dilation != 1 (Conv2d args) are not supported.
    n, cin, h, w = x_nchw.shape
    kh, kw, wcin, cout = weight.shape
    assert wcin == cin

    out_dtype = x_nchw.dtype
    if compute_dtype is None:
        compute_dtype = x_nchw.dtype

    # ---- layout glue (plain JAX): NCHW -> NHWC, spatial pad, im2col ----
    x = jnp.transpose(x_nchw, (0, 2, 3, 1))
    x = jnp.pad(x, ((0, 0), (padding, padding), (padding, padding), (0, 0)))
    hp, wp = h + 2 * padding, w + 2 * padding
    oh = (hp - kh) // stride + 1
    ow = (wp - kw) // stride + 1

    taps = []
    for i in range(kh):
        for j in range(kw):
            taps.append(x[:, i:i + (oh - 1) * stride + 1:stride,
                          j:j + (ow - 1) * stride + 1:stride, :])
    patches = jnp.concatenate(taps, axis=-1)              # (N, OH, OW, KH*KW*Cin)

    k_dim = kh * kw * cin
    m_dim = n * oh * ow
    patches = patches.reshape(m_dim, k_dim)

    # ---- fold eval-mode BatchNorm into the weights + a per-channel shift ----
    scale = gamma / jnp.sqrt(running_var + eps)           # (Cout,)
    shift = beta - running_mean * scale                   # (Cout,)
    w2d = weight.reshape(k_dim, cout) * scale[None, :]    # BN scale folded into W

    # ---- pad to lane/sublane-friendly sizes (lane-dense loads & stores) ----
    if m_dim >= 8 * 512:
        tm = 512
    elif m_dim >= 4 * 256:
        tm = 256
    else:
        tm = 128
    m_pad = _round_up(m_dim, tm)
    k_pad = _round_up(k_dim, 128)
    c_pad = _round_up(cout, 128)
    tk = _pick_tile(k_pad)
    tn = _pick_tile(c_pad, (256, 128))

    patches = jnp.pad(patches, ((0, m_pad - m_dim), (0, k_pad - k_dim)))
    patches = patches.astype(compute_dtype)
    w2d = jnp.pad(w2d, ((0, k_pad - k_dim), (0, c_pad - cout))).astype(compute_dtype)
    shift_p = jnp.pad(shift, (0, c_pad - cout)).reshape(1, c_pad).astype(jnp.float32)

    # ---- VMEM budget for these tiles (double-buffered in/out + f32 acc) ----
    cb = jnp.dtype(compute_dtype).itemsize
    ob = jnp.dtype(out_dtype).itemsize
    per_step = tm * tk * cb + tk * tn * cb + tn * 4 + tm * tn * ob
    vmem_limit = int(min(max(4 * per_step + tm * tn * 4, 16 * 1024 * 1024),
                         48 * 1024 * 1024))

    kernel = functools.partial(_conv_bn_relu_mm_kernel, apply_relu=relu)

    out = pl.pallas_call(
        kernel,
        out_shape=jax.ShapeDtypeStruct((m_pad, c_pad), out_dtype),
        grid_spec=pltpu.PrefetchScalarGridSpec(
            num_scalar_prefetch=0,
            grid=(m_pad // tm, c_pad // tn, k_pad // tk),
            in_specs=[
                pl.BlockSpec((tm, tk), lambda i, j, k: (i, k)),
                pl.BlockSpec((tk, tn), lambda i, j, k: (k, j)),
                pl.BlockSpec((1, tn), lambda i, j, k: (0, j)),
            ],
            out_specs=pl.BlockSpec((tm, tn), lambda i, j, k: (i, j)),
            scratch_shapes=[pltpu.VMEM((tm, tn), jnp.float32)],
        ),
        compiler_params=pltpu.CompilerParams(
            dimension_semantics=("parallel", "parallel", "arbitrary"),
            vmem_limit_bytes=vmem_limit),
    )(patches, w2d, shift_p)

    # Drop channel/row padding, back to NCHW to match the PyTorch convention.
    out = out[:m_dim, :cout].reshape(n, oh, ow, cout)
    return jnp.transpose(out, (0, 3, 1, 2))


def _reference(x_nchw, weight, gamma, beta, running_mean, running_var,
               *, stride, padding, eps=1e-5, relu=True):
    """Pure-JAX reference (NCHW conv + eval BN + optional ReLU)."""
    w_oihw = jnp.transpose(weight, (3, 2, 0, 1))          # (Cout, Cin, KH, KW)
    y = jax.lax.conv_general_dilated(
        x_nchw, w_oihw, window_strides=(stride, stride),
        padding=[(padding, padding), (padding, padding)],
        dimension_numbers=("NCHW", "OIHW", "NCHW"))
    scale = (gamma / jnp.sqrt(running_var + eps)).reshape(1, -1, 1, 1)
    shift = (beta - running_mean * gamma / jnp.sqrt(running_var + eps)).reshape(1, -1, 1, 1)
    y = y * scale + shift
    if relu:
        y = jnp.maximum(y, 0.0)
    return y


if __name__ == "__main__":
    key = jax.random.PRNGKey(0)
    k1, k2, k3, k4, k5, k6 = jax.random.split(key, 6)

    # BasicConv(in_planes=4, out_planes=8, kernel_size=3, stride=1, padding=1)
    N, Cin, H, W = 2, 4, 16, 16
    Cout, KH, KW = 8, 3, 3

    x = jax.random.normal(k1, (N, Cin, H, W), dtype=jnp.float32)
    weight = 0.1 * jax.random.normal(k2, (KH, KW, Cin, Cout), dtype=jnp.float32)
    gamma = 1.0 + 0.1 * jax.random.normal(k3, (Cout,), dtype=jnp.float32)
    beta = 0.1 * jax.random.normal(k4, (Cout,), dtype=jnp.float32)
    running_mean = 0.1 * jax.random.normal(k5, (Cout,), dtype=jnp.float32)
    running_var = jnp.abs(jax.random.normal(k6, (Cout,), dtype=jnp.float32)) + 0.5

    conv = jax.jit(basic_conv,
                   static_argnames=("stride", "padding", "eps", "relu",
                                    "compute_dtype"))

    # 1) stride=1, padding=1, ReLU, f32 matmul.
    out = jax.block_until_ready(conv(
        x, weight, gamma, beta, running_mean, running_var, stride=1, padding=1))
    ref = _reference(x, weight, gamma, beta, running_mean, running_var,
                     stride=1, padding=1)
    assert out.shape == (N, Cout, H, W)
    assert jnp.allclose(out, ref, atol=1e-4, rtol=1e-4)

    # 2) stride=2 (handled by wrapper-side im2col, no strided in-kernel loads).
    out2 = jax.block_until_ready(conv(
        x, weight, gamma, beta, running_mean, running_var, stride=2, padding=1))
    ref2 = _reference(x, weight, gamma, beta, running_mean, running_var,
                      stride=2, padding=1)
    assert out2.shape == ref2.shape
    assert jnp.allclose(out2, ref2, atol=1e-4, rtol=1e-4)

    # 3) relu=False path.
    out3 = jax.block_until_ready(conv(
        x, weight, gamma, beta, running_mean, running_var, stride=1, padding=1,
        relu=False))
    ref3 = _reference(x, weight, gamma, beta, running_mean, running_var,
                      stride=1, padding=1, relu=False)
    assert jnp.allclose(out3, ref3, atol=1e-4, rtol=1e-4)

    # 4) bf16 matmul operands (v6e/v7x MXU fast path), f32 accumulation.
    out4 = jax.block_until_ready(conv(
        x, weight, gamma, beta, running_mean, running_var, stride=1, padding=1,
        compute_dtype=jnp.bfloat16))
    assert jnp.allclose(out4, ref, atol=5e-2, rtol=5e-2)

    print("KERNEL_OK")
</pallas_src>

<mosaic_0001>
module attributes {stable_mosaic.version = 11 : i64} {
  func.func @_conv_bn_relu_mm_kernel(%arg0: i32, %arg1: i32, %arg2: i32, %arg3: memref<128x128xf32, #tpu.memory_space<vmem>>, %arg4: memref<128x128xf32, #tpu.memory_space<vmem>>, %arg5: memref<1x128xf32, #tpu.memory_space<vmem>>, %arg6: memref<128x128xf32, #tpu.memory_space<vmem>>, %arg7: memref<128x128xf32, #tpu.memory_space<vmem>>) attributes {dimension_semantics = [#tpu.dimension_semantics<parallel>, #tpu.dimension_semantics<parallel>, #tpu.dimension_semantics<arbitrary>], iteration_bounds = array<i64: 4, 1, 1>, scalar_prefetch = 0 : i64, scratch_operands = 1 : i64, tpu.core_type = #tpu.core_type<tc>, window_params = [{transform_indices = @transform_0, window_bounds = array<i64: 128, 128>}, {transform_indices = @transform_1, window_bounds = array<i64: 128, 128>}, {transform_indices = @transform_2, window_bounds = array<i64: 1, 128>}, {transform_indices = @transform_3, window_bounds = array<i64: 128, 128>}]} {
    %c0_i32 = arith.constant 0 : i32
    %0 = arith.cmpi eq, %arg2, %c0_i32 : i32
    %1 = arith.extui %0 : i1 to i32
    %c0_i32_0 = arith.constant 0 : i32
    %2 = arith.cmpi ne, %1, %c0_i32_0 : i32
    scf.if %2 {
      %cst_10 = arith.constant 0.000000e+00 : f32
      %12 = vector.broadcast %cst_10 : f32 to vector<128x128xf32>
      %c0_11 = arith.constant 0 : index
      %c0_12 = arith.constant 0 : index
      %13 = vector.load %arg7[%c0_11, %c0_12] : memref<128x128xf32, #tpu.memory_space<vmem>>, vector<128x128xf32>
      tpu.vector_store %arg7[%c0_11, %c0_12], %12 {strides = array<i32>} : memref<128x128xf32, #tpu.memory_space<vmem>>, vector<128x128xf32>,
    } else {
    }
    %c0 = arith.constant 0 : index
    %c0_1 = arith.constant 0 : index
    %3 = vector.load %arg7[%c0, %c0_1] : memref<128x128xf32, #tpu.memory_space<vmem>>, vector<128x128xf32>
    %c0_2 = arith.constant 0 : index
    %c0_3 = arith.constant 0 : index
    %4 = vector.load %arg3[%c0_2, %c0_3] : memref<128x128xf32, #tpu.memory_space<vmem>>, vector<128x128xf32>
    %c0_4 = arith.constant 0 : index
    %c0_5 = arith.constant 0 : index
    %5 = vector.load %arg4[%c0_4, %c0_5] : memref<128x128xf32, #tpu.memory_space<vmem>>, vector<128x128xf32>
    %cst = arith.constant dense<0.000000e+00> : vector<128x128xf32>
    %6 = tpu.matmul %4, %5, %cst {dimension_numbers = #tpu.dot_dimension_numbers<[1], [0], [0], [1], [0, 0, 1, 1], [], []>} : vector<128x128xf32>, vector<128x128xf32>, vector<128x128xf32> -> vector<128x128xf32>
    %7 = arith.addf %3, %6 : vector<128x128xf32>
    %c0_6 = arith.constant 0 : index
    %c0_7 = arith.constant 0 : index
    %8 = vector.load %arg7[%c0_6, %c0_7] : memref<128x128xf32, #tpu.memory_space<vmem>>, vector<128x128xf32>
    tpu.vector_store %arg7[%c0_6, %c0_7], %7 {strides = array<i32>} : memref<128x128xf32, #tpu.memory_space<vmem>>, vector<128x128xf32>,
    %c0_i32_8 = arith.constant 0 : i32
    %9 = arith.cmpi eq, %arg2, %c0_i32_8 : i32
    %10 = arith.extui %9 : i1 to i32
    %c0_i32_9 = arith.constant 0 : i32
    %11 = arith.cmpi ne, %10, %c0_i32_9 : i32
    scf.if %11 {
      %c0_10 = arith.constant 0 : index
      %c0_11 = arith.constant 0 : index
      %12 = vector.load %arg7[%c0_10, %c0_11] : memref<128x128xf32, #tpu.memory_space<vmem>>, vector<128x128xf32>
      %c0_12 = arith.constant 0 : index
      %c0_13 = arith.constant 0 : index
      %13 = vector.load %arg5[%c0_12, %c0_13] : memref<1x128xf32, #tpu.memory_space<vmem>>, vector<1x128xf32>
      %14 = vector.broadcast %13 : vector<1x128xf32> to vector<128x128xf32>
      %15 = arith.addf %12, %14 : vector<128x128xf32>
      %cst_14 = arith.constant 0.000000e+00 : f32
      %16 = vector.broadcast %cst_14 : f32 to vector<128x128xf32>
      %17 = arith.maximumf %15, %16 : vector<128x128xf32>
      %c0_15 = arith.constant 0 : index
      %c0_16 = arith.constant 0 : index
      %18 = vector.load %arg6[%c0_15, %c0_16] : memref<128x128xf32, #tpu.memory_space<vmem>>, vector<128x128xf32>
      tpu.vector_store %arg6[%c0_15, %c0_16], %17 {strides = array<i32>} : memref<128x128xf32, #tpu.memory_space<vmem>>, vector<128x128xf32>,
    } else {
    }
    return
  }
  func.func @transform_0(%arg0: i32, %arg1: i32, %arg2: i32) -> (i32, i32) {
    %c0_i32 = arith.constant 0 : i32
    return %arg0, %arg2 : i32, i32
  }
  func.func @transform_1(%arg0: i32, %arg1: i32, %arg2: i32) -> (i32, i32) {
    %c0_i32 = arith.constant 0 : i32
    return %arg2, %arg1 : i32, i32
  }
  func.func @transform_2(%arg0: i32, %arg1: i32, %arg2: i32) -> (i32, i32) {
    %c0_i32 = arith.constant 0 : i32
    %c0_i32_0 = arith.constant 0 : i32
    return %c0_i32, %arg1 : i32, i32
  }
  func.func @transform_3(%arg0: i32, %arg1: i32, %arg2: i32) -> (i32, i32) {
    %c0_i32 = arith.constant 0 : i32
    return %arg0, %arg1 : i32, i32
  }
}

</mosaic_0001>

<bundles_post_ra>
// kernel: basic_conv.1
= control target key start
LH: loop header
LB: loop body
LE: loop exit
PB: predicated region body
PF: predicated region fallthrough
CT: control target
= control target key end

     0   :  { %s736_s12 = smov 0   ;;  %s738_s13 = smov 0   ;;  %s866_s0 = inlined_call_operand.vmem [shape: f32[512,128], index: 0, kind: input, shape index: {}]   ;;  %s867_s1 = inlined_call_operand.vmem [shape: f32[128,128], index: 1, kind: input, shape index: {}]   ;;  %s868_s2 = inlined_call_operand.vmem [shape: f32[1,128], index: 2, kind: input, shape index: {}]   ;;  %s869_s3 = inlined_call_operand.vmem [shape: f32[512,128], index: 3, kind: output, shape index: {}]  }
   0x1   :  { %s740_s14 = smov 0  }
   0x2 LB: > { %s32_s15 = sadd.s32 1, %s710_s13  ;;  %p612_p0 = scmp.ge.s32.totalorder %s714_s14, 1  ;;  %s714_s14 = sphi %s740_s14, %s13_s14   ;;  %s710_s13 = sphi %s738_s13, %s871_s13   ;;  %s706_s12 = sphi %s736_s12, %s870_s12  }
   0x3   : > { %p34_p1 = scmp.ge.s32.totalorder %s32_s15, 4  ;;  %p188_p2 = scmp.lt.s32.totalorder %s714_s14, 5 }
   0x5   : > { %s873_s15 = smov (%p34_p1, %s32_s15), 0  ;;  %p189_p3 = pnand %p612_p0, %p188_p2 }
   0x6   : > { %s613_s5 = sshll.u32 (!%p189_p3), %s706_s12, 4 }
   0x7   : > { %192 = sbr.rel (%p189_p3) target bundleno = 206 (0xce), region = 32  ;;  %p230_p4 = scmp.lt.s32.totalorder (!%p189_p3), %s613_s5, 63 }
   0xc   : > { %v326_v0 = vld [vmem:[%s867_s1 + $0x78] sm:$0xff]  ;;  %v325_v1 = vld [vmem:[%s867_s1 + $0x70] sm:$0xff]  ;;  %v324_v2 = vld [vmem:[%s867_s1 + $0x68] sm:$0xff]  ;;  %s875_s5 = smov (!%p230_p4, %s613_s5), 63 }
   0xd   : > { %620 = vmatpush.msra.mxu2 %v326_v0  ;;  %621 = vmatpush.msra.mxu3 %v326_v0  ;;  %v323_v3 = vld [vmem:[%s867_s1 + $0x60] sm:$0xff]  ;;  %v322_v4 = vld [vmem:[%s867_s1 + $0x58] sm:$0xff]  ;;  %v321_v5 = vld [vmem:[%s867_s1 + $0x50] sm:$0xff]  ;;  %s614_s19 = sshll.u32 %s875_s5, 3 }
   0xe   : > { %327 = vmatpush.msra.mxu0 %v326_v0  ;;  %619 = vmatpush.msra.mxu1 %v326_v0  ;;  %v320_v6 = vld [vmem:[%s867_s1 + $0x48] sm:$0xff]  ;;  %v319_v7 = vld [vmem:[%s867_s1 + $0x40] sm:$0xff]  ;;  %v318_v8 = vld [vmem:[%s867_s1 + $0x38] sm:$0xff]  ;;  %s810_s26 = scalar_lea.vmem %s866_s0, %s614_s19  ;;  %s839_s7 = scalar_lea.vmem %s869_s3, %s614_s19 }
   0xf   : > { %623 = vmatpush.msra.mxu2 %v325_v1  ;;  %624 = vmatpush.msra.mxu3 %v325_v1  ;;  %v317_v9 = vld [vmem:[%s867_s1 + $0x30] sm:$0xff]  ;;  %v316_v10 = vld [vmem:[%s867_s1 + $0x28] sm:$0xff]  ;;  %v315_v11 = vld [vmem:[%s867_s1 + $0x20] sm:$0xff] }
  0x10   : > { %328 = vmatpush.msra.mxu0 %v325_v1  ;;  %622 = vmatpush.msra.mxu1 %v325_v1  ;;  %v314_v12 = vld [vmem:[%s867_s1 + $0x18] sm:$0xff]  ;;  %v313_v13 = vld [vmem:[%s867_s1 + $0x10] sm:$0xff]  ;;  %v312_v14 = vld [vmem:[%s867_s1 + $0x8] sm:$0xff] }
  0x11   : > { %626 = vmatpush.msra.mxu2 %v324_v2  ;;  %627 = vmatpush.msra.mxu3 %v324_v2  ;;  %v311_v15 = vld [vmem:[%s867_s1] sm:$0xff]  ;;  %v304_v20 = vld [vmem:[%s810_s26 + $0x48] sm:$0xff]  ;;  %v305_v24 = vld [vmem:[%s810_s26 + $0x50] sm:$0xff] }
  0x12   : > { %329 = vmatpush.msra.mxu0 %v324_v2  ;;  %625 = vmatpush.msra.mxu1 %v324_v2  ;;  %v303_v16 = vld [vmem:[%s810_s26 + $0x40] sm:$0xff]  ;;  %v308_v21 = vld [vmem:[%s810_s26 + $0x68] sm:$0xff]  ;;  %v309_v25 = vld [vmem:[%s810_s26 + $0x70] sm:$0xff] }
  0x13   : > { %629 = vmatpush.msra.mxu2 %v323_v3  ;;  %630 = vmatpush.msra.mxu3 %v323_v3  ;;  %v307_v17 = vld [vmem:[%s810_s26 + $0x60] sm:$0xff]  ;;  %v296_v22 = vld [vmem:[%s810_s26 + $0x8] sm:$0xff]  ;;  %v297_v26 = vld [vmem:[%s810_s26 + $0x10] sm:$0xff] }
  0x14   : > { %330 = vmatpush.msra.mxu0 %v323_v3  ;;  %628 = vmatpush.msra.mxu1 %v323_v3  ;;  %v295_v18 = vld [vmem:[%s810_s26] sm:$0xff]  ;;  %v300_v23 = vld [vmem:[%s810_s26 + $0x28] sm:$0xff]  ;;  %v301_v27 = vld [vmem:[%s810_s26 + $0x30] sm:$0xff] }
  0x15   : > { %632 = vmatpush.msra.mxu2 %v322_v4  ;;  %633 = vmatpush.msra.mxu3 %v322_v4  ;;  %v299_v19 = vld [vmem:[%s810_s26 + $0x20] sm:$0xff]  ;;  %v306_v28 = vld [vmem:[%s810_s26 + $0x58] sm:$0xff] }
  0x16   : > { %331 = vmatpush.msra.mxu0 %v322_v4  ;;  %631 = vmatpush.msra.mxu1 %v322_v4  ;;  %v310_v29 = vld [vmem:[%s810_s26 + $0x78] sm:$0xff]  ;;  %v691_v32 = vld [vmem:[%s868_s2] ss:$0 sm:$0xff] }
  0x17   : > { %635 = vmatpush.msra.mxu2 %v321_v5  ;;  %636 = vmatpush.msra.mxu3 %v321_v5  ;;  %v298_v30 = vld [vmem:[%s810_s26 + $0x18] sm:$0xff] }
  0x18   : > { %332 = vmatpush.msra.mxu0 %v321_v5  ;;  %634 = vmatpush.msra.mxu1 %v321_v5  ;;  %v302_v31 = vld [vmem:[%s810_s26 + $0x38] sm:$0xff] }
  0x19   : > { %638 = vmatpush.msra.mxu2 %v320_v6  ;;  %639 = vmatpush.msra.mxu3 %v320_v6 }
  0x1a   : > { %333 = vmatpush.msra.mxu0 %v320_v6  ;;  %637 = vmatpush.msra.mxu1 %v320_v6 }
  0x1b   : > { %641 = vmatpush.msra.mxu2 %v319_v7  ;;  %642 = vmatpush.msra.mxu3 %v319_v7 }
  0x1c   : > { %334 = vmatpush.msra.mxu0 %v319_v7  ;;  %640 = vmatpush.msra.mxu1 %v319_v7 }
  0x1d   : > { %644 = vmatpush.msra.mxu2 %v318_v8  ;;  %645 = vmatpush.msra.mxu3 %v318_v8 }
  0x1e   : > { %335 = vmatpush.msra.mxu0 %v318_v8  ;;  %643 = vmatpush.msra.mxu1 %v318_v8 }
  0x1f   : > { %647 = vmatpush.msra.mxu2 %v317_v9  ;;  %648 = vmatpush.msra.mxu3 %v317_v9 }
  0x20   : > { %336 = vmatpush.msra.mxu0 %v317_v9  ;;  %646 = vmatpush.msra.mxu1 %v317_v9 }
  0x21   : > { %650 = vmatpush.msra.mxu2 %v316_v10  ;;  %651 = vmatpush.msra.mxu3 %v316_v10 }
  0x22   : > { %337 = vmatpush.msra.mxu0 %v316_v10  ;;  %649 = vmatpush.msra.mxu1 %v316_v10 }
  0x23   : > { %653 = vmatpush.msra.mxu2 %v315_v11  ;;  %654 = vmatpush.msra.mxu3 %v315_v11 }
  0x24   : > { %338 = vmatpush.msra.mxu0 %v315_v11  ;;  %652 = vmatpush.msra.mxu1 %v315_v11 }
  0x25   : > { %656 = vmatpush.msra.mxu2 %v314_v12  ;;  %657 = vmatpush.msra.mxu3 %v314_v12 }
  0x26   : > { %339 = vmatpush.msra.mxu0 %v314_v12  ;;  %655 = vmatpush.msra.mxu1 %v314_v12 }
  0x27   : > { %659 = vmatpush.msra.mxu2 %v313_v13  ;;  %660 = vmatpush.msra.mxu3 %v313_v13 }
  0x28   : > { %340 = vmatpush.msra.mxu0 %v313_v13  ;;  %658 = vmatpush.msra.mxu1 %v313_v13 }
  0x29   : > { %662 = vmatpush.msra.mxu2 %v312_v14  ;;  %663 = vmatpush.msra.mxu3 %v312_v14 }
  0x2a   : > { %341 = vmatpush.msra.mxu0 %v312_v14  ;;  %661 = vmatpush.msra.mxu1 %v312_v14 }
  0x2b   : > { %665 = vmatpush.msra.mxu2 %v311_v15  ;;  %666 = vmatpush.msra.mxu3 %v311_v15 }
  0x2c   : > { %367 = vmatmul.f32.vlgmr.msra.gmra.mxu2 %v303_v16  ;;  %379 = vmatmul.f32.vlgmr.msra.gmra.mxu3 %v307_v17 }
  0x2d   : > { %342 = vmatpush.msra.mxu0 %v311_v15  ;;  %664 = vmatpush.msra.mxu1 %v311_v15 }
  0x2e   : > { %343 = vmatmul.f32.vlgmr.msra.gmra.mxu0 %v295_v18  ;;  %355 = vmatmul.f32.vlgmr.msra.gmra.mxu1 %v299_v19 }
  0x34   : > { %370 = vmatmul.f32.gmra.mxu2 %v304_v20  ;;  %382 = vmatmul.f32.gmra.mxu3 %v308_v21 }
  0x36   : > { %346 = vmatmul.f32.gmra.mxu0 %v296_v22  ;;  %358 = vmatmul.f32.gmra.mxu1 %v300_v23 }
  0x3c   : > { %373 = vmatmul.f32.gmra.mxu2 %v305_v24  ;;  %385 = vmatmul.f32.gmra.mxu3 %v309_v25 }
  0x3e   : > { %349 = vmatmul.f32.gmra.mxu0 %v297_v26  ;;  %361 = vmatmul.f32.gmra.mxu1 %v301_v27 }
  0x44   : > { %376 = vmatmul.f32.gmra.mxu2 %v306_v28  ;;  %388 = vmatmul.f32.gmra.mxu3 %v310_v29 }
  0x46   : > { %352 = vmatmul.f32.gmra.mxu0 %v298_v30  ;;  %364 = vmatmul.f32.gmra.mxu1 %v302_v31 }
  0xab   : > { %v344_v33 = vpop.f32.mrf.mxu0  ;;  %v356_v34 = vpop.f32.mrf.mxu1 }
  0xac   : > { %v447_v35 = vadd.f32 %v691_v32, %v344_v33  ;;  %v451_v36 = vadd.f32 %v691_v32, %v356_v34 }
  0xae   : > { %v463_v37 = vmax.f32 %v447_v35, 0.0  ;;  %v467_v38 = vmax.f32 %v451_v36, 0.0 }
  0xaf   : > { %v368_v39 = vpop.f32.mrf.mxu2  ;;  %v380_v40 = vpop.f32.mrf.mxu3 }
  0xb0   : > { %479 = vst [vmem:[%s839_s7] sm:$0xff] %v463_v37  ;;  %v455_v41 = vadd.f32 %v691_v32, %v368_v39  ;;  %v459_v42 = vadd.f32 %v691_v32, %v380_v40 }
  0xb1   : > { %483 = vst [vmem:[%s839_s7 + $0x20] sm:$0xff] %v467_v38 }
  0xb2   : > { %v471_v43 = vmax.f32 %v455_v41, 0.0  ;;  %v475_v44 = vmax.f32 %v459_v42, 0.0 }
  0xb3   : > { %v347_v45 = vpop.f32.mrf.mxu0  ;;  %v359_v46 = vpop.f32.mrf.mxu1 }
  0xb4   : > { %487 = vst [vmem:[%s839_s7 + $0x40] sm:$0xff] %v471_v43  ;;  %v448_v47 = vadd.f32 %v691_v32, %v347_v45  ;;  %v452_v48 = vadd.f32 %v691_v32, %v359_v46 }
  0xb5   : > { %491 = vst [vmem:[%s839_s7 + $0x60] sm:$0xff] %v475_v44 }
  0xb6   : > { %v464_v49 = vmax.f32 %v448_v47, 0.0  ;;  %v468_v50 = vmax.f32 %v452_v48, 0.0 }
  0xb7   : > { %v371_v51 = vpop.f32.mrf.mxu2  ;;  %v383_v52 = vpop.f32.mrf.mxu3 }
  0xb8   : > { %480 = vst [vmem:[%s839_s7 + $0x8] sm:$0xff] %v464_v49  ;;  %v456_v53 = vadd.f32 %v691_v32, %v371_v51  ;;  %v460_v54 = vadd.f32 %v691_v32, %v383_v52 }
  0xb9   : > { %484 = vst [vmem:[%s839_s7 + $0x28] sm:$0xff] %v468_v50 }
  0xba   : > { %v472_v55 = vmax.f32 %v456_v53, 0.0  ;;  %v476_v56 = vmax.f32 %v460_v54, 0.0 }
  0xbb   : > { %v350_v57 = vpop.f32.mrf.mxu0  ;;  %v362_v58 = vpop.f32.mrf.mxu1 }
  0xbc   : > { %488 = vst [vmem:[%s839_s7 + $0x48] sm:$0xff] %v472_v55  ;;  %v449_v59 = vadd.f32 %v691_v32, %v350_v57  ;;  %v453_v60 = vadd.f32 %v691_v32, %v362_v58 }
  0xbd   : > { %492 = vst [vmem:[%s839_s7 + $0x68] sm:$0xff] %v476_v56 }
  0xbe   : > { %v465_v61 = vmax.f32 %v449_v59, 0.0  ;;  %v469_v62 = vmax.f32 %v453_v60, 0.0 }
  0xbf   : > { %v374_v63 = vpop.f32.mrf.mxu2  ;;  %v386_v0 = vpop.f32.mrf.mxu3 }
  0xc0   : > { %481 = vst [vmem:[%s839_s7 + $0x10] sm:$0xff] %v465_v61  ;;  %v457_v1 = vadd.f32 %v691_v32, %v374_v63  ;;  %v461_v2 = vadd.f32 %v691_v32, %v386_v0 }
  0xc1   : > { %485 = vst [vmem:[%s839_s7 + $0x30] sm:$0xff] %v469_v62 }
  0xc2   : > { %v473_v3 = vmax.f32 %v457_v1, 0.0  ;;  %v477_v4 = vmax.f32 %v461_v2, 0.0 }
  0xc3   : > { %v353_v5 = vpop.f32.mrf.mxu0  ;;  %v365_v6 = vpop.f32.mrf.mxu1 }
  0xc4   : > { %489 = vst [vmem:[%s839_s7 + $0x50] sm:$0xff] %v473_v3  ;;  %v450_v7 = vadd.f32 %v691_v32, %v353_v5  ;;  %v454_v8 = vadd.f32 %v691_v32, %v365_v6 }
  0xc5   : > { %493 = vst [vmem:[%s839_s7 + $0x70] sm:$0xff] %v477_v4 }
  0xc6   : > { %v466_v9 = vmax.f32 %v450_v7, 0.0  ;;  %v470_v10 = vmax.f32 %v454_v8, 0.0 }
  0xc7   : > { %v377_v11 = vpop.f32.mrf.mxu2  ;;  %v389_v12 = vpop.f32.mrf.mxu3 }
  0xc8   : > { %482 = vst [vmem:[%s839_s7 + $0x18] sm:$0xff] %v466_v9  ;;  %v458_v13 = vadd.f32 %v691_v32, %v377_v11  ;;  %v462_v14 = vadd.f32 %v691_v32, %v389_v12 }
  0xc9   : > { %486 = vst [vmem:[%s839_s7 + $0x38] sm:$0xff] %v470_v10 }
  0xca   : > { %v474_v15 = vmax.f32 %v458_v13, 0.0  ;;  %v478_v16 = vmax.f32 %v462_v14, 0.0 }
  0xcc   : > { %490 = vst [vmem:[%s839_s7 + $0x58] sm:$0xff] %v474_v15 }
  0xcd   : > { %494 = vst [vmem:[%s839_s7 + $0x78] sm:$0xff] %v478_v16 }
  0xce PF: > { %s13_s14 = sadd.s32 1, %s714_s14   ;;  %s870_s12 = smov %s710_s13 }
  0xcf   : > { %p10_p5 = scmp.ge.s32.totalorder %s13_s14, 6   ;;  %s871_s13 = smov %s873_s15 }
  0xd1   :  { %12 = sbr.rel (!%p10_p5) target bundleno = 2 (0x2), region = 76 }

</bundles_post_ra>
